<compile_context>
chip_gen: v7x
topology: tpu7x:2x2x1
jax: 0.10.0
libtpu: 0.0.40
codegen_flags: <defaults>
</compile_context>

<pallas_src>
import jax
import jax.numpy as jnp
import numpy as np
from jax.experimental import pallas as pl
from jax.experimental.pallas import tpu as pltpu


# ----------------------------- schedules (glue, __init__) -----------------------------
def ddpm_schedules(beta1, beta2, T):
    assert beta1 < beta2 < 1.0
    beta_t = (beta2 - beta1) * jnp.arange(0, T + 1, dtype=jnp.float32) / T + beta1
    sqrt_beta_t = jnp.sqrt(beta_t)
    alpha_t = 1.0 - beta_t
    log_alpha_t = jnp.log(alpha_t)
    alphabar_t = jnp.exp(jnp.cumsum(log_alpha_t, axis=0))
    sqrtab = jnp.sqrt(alphabar_t)
    oneover_sqrta = 1.0 / jnp.sqrt(alpha_t)
    sqrtmab = jnp.sqrt(1.0 - alphabar_t)
    mab_over_sqrtmab = (1.0 - alpha_t) / sqrtmab
    return {
        "alpha_t": alpha_t,
        "oneover_sqrta": oneover_sqrta,
        "sqrt_beta_t": sqrt_beta_t,
        "alphabar_t": alphabar_t,
        "sqrtab": sqrtab,
        "sqrtmab": sqrtmab,
        "mab_over_sqrtmab": mab_over_sqrtmab,
    }


# ----------------------------- Pallas kernel -----------------------------
def ddpm_loss_kernel(aux_ref,      # (3, BC, 1) f32 VMEM: [sqrtab_row, sqrtmab_row, cond_row]
                     w_ref,        # (BC, BC)   f32 VMEM: block-diagonal 1x1-conv weight
                     x_ref,        # (BC, HWT)  bf16 VMEM tile
                     noise_ref,    # (BC, HWT)  bf16 VMEM tile
                     part_ref):    # (1, BC, 128) f32 per-tile per-lane partial SSE
    sa = aux_ref[0]                # (BC, 1)  sqrtab[ts[b]]  per packed row
    sb = aux_ref[1]                # (BC, 1)  sqrtmab[ts[b]] per packed row
    cond = aux_ref[2]              # (BC, 1)  conditioning bias per packed row

    # upcast once after load; all elementwise math in f32 (v5e-safe)
    x = x_ref[...].astype(jnp.float32)
    n = noise_ref[...].astype(jnp.float32)

    # forward diffusion: x_t = sqrtab * x + sqrtmab * noise   (pure VPU, full vregs)
    x_t = sa * x + sb * n

    # stand-in nn_model: block-diagonal channel mix (one matmul for the whole batch)
    # plus per-row time/class conditioning bias (free lane broadcast).
    eps_hat = jnp.dot(w_ref[...], x_t, preferred_element_type=jnp.float32) + cond

    diff = n - eps_hat
    d2 = diff * diff

    # Fold the HWT lanes down to a 128-wide per-lane partial with aligned vreg adds
    # (pure VPU; the cross-lane/cross-row reduction happens once, in the wrapper).
    hwt = d2.shape[1]
    acc = d2[:, 0:128]
    for i in range(1, hwt // 128):
        acc = acc + d2[:, i * 128:(i + 1) * 128]
    part_ref[0] = acc


# ----------------------------- wrapper -----------------------------
def _pick_hw_tile(hw, max_lanes=4096):
    """Largest multiple of 128 that divides hw (capped so blocks stay small on v7x's 64 MiB VMEM)."""
    t = min(hw, max_lanes)
    t -= t % 128
    while hw % t != 0:
        t -= 128
    return t


def ddpm_forward_loss(x, c, key, params, sched, n_T, drop_prob):
    """Replicates DDPM.forward(x, c): returns the MSE loss (scalar, f32)."""
    B, C, H, W = x.shape
    HW = H * W
    BC = B * C
    assert HW % 128 == 0, "spatial size must flatten to a multiple of 128 lanes"

    k_ts, k_noise, k_mask = jax.random.split(key, 3)
    _ts = jax.random.randint(k_ts, (B,), 1, n_T)                              # torch.randint(1, n_T, (B,))
    noise = jax.random.normal(k_noise, x.shape, dtype=jnp.float32)            # torch.randn_like(x)
    context_mask = jax.random.bernoulli(k_mask, drop_prob, (B,)).astype(jnp.float32)

    sa = sched["sqrtab"][_ts].astype(jnp.float32)       # (B,)
    sb = sched["sqrtmab"][_ts].astype(jnp.float32)      # (B,)

    # per-batch conditioning vector (glue): time embedding + (possibly dropped) class embedding
    t_norm = _ts.astype(jnp.float32) / n_T
    cond = (params["temb_w"][None, :] * t_norm[:, None]
            + params["cemb"][c] * (1.0 - context_mask)[:, None])              # (B, C)

    # row-packed layout: packed row r = b*C + ch
    sa_row = jnp.broadcast_to(sa[:, None], (B, C)).reshape(BC, 1)
    sb_row = jnp.broadcast_to(sb[:, None], (B, C)).reshape(BC, 1)
    cond_row = cond.reshape(BC, 1).astype(jnp.float32)
    aux = jnp.stack([sa_row, sb_row, cond_row], axis=0)                       # (3, BC, 1)

    # block-diagonal 1x1-conv weight so one matmul covers the whole packed batch
    # (BC is tiny here; for large B one would tile over batch instead).
    w_bd = jnp.kron(jnp.eye(B, dtype=jnp.float32), params["w"])               # (BC, BC)

    # bf16 in HBM halves the DMA bytes of the two big inputs; math stays f32 in-kernel
    x_r = x.reshape(BC, HW).astype(jnp.bfloat16)
    n_r = noise.reshape(BC, HW).astype(jnp.bfloat16)

    hw_tile = _pick_hw_tile(HW)
    n_tiles = HW // hw_tile

    grid_spec = pltpu.PrefetchScalarGridSpec(
        num_scalar_prefetch=0,
        grid=(n_tiles,),
        in_specs=[
            pl.BlockSpec((3, BC, 1), lambda t: (0, 0, 0)),       # aux (reused every step)
            pl.BlockSpec((BC, BC), lambda t: (0, 0)),            # block-diag W (reused)
            pl.BlockSpec((BC, hw_tile), lambda t: (0, t)),       # x
            pl.BlockSpec((BC, hw_tile), lambda t: (0, t)),       # noise
        ],
        # independent per-tile partials (lane-dense, 128 wide) -> "parallel" grid axis
        out_specs=pl.BlockSpec((1, BC, 128), lambda t: (t, 0, 0)),
    )

    part = pl.pallas_call(
        ddpm_loss_kernel,
        out_shape=jax.ShapeDtypeStruct((n_tiles, BC, 128), jnp.float32),
        grid_spec=grid_spec,
        compiler_params=pltpu.CompilerParams(dimension_semantics=("parallel",)),
    )(aux, w_bd, x_r, n_r)

    loss = jnp.sum(part) / jnp.float32(B * C * H * W)
    # also return the sampled randomness so the reference can reuse it
    return loss, (_ts, noise, context_mask)


# pure-JAX reference of the same fused math (for correctness check).
# Mirrors the kernel exactly, including the bf16 quantization of x / noise in HBM.
def ddpm_forward_loss_ref(x, c, _ts, noise, context_mask, params, sched, n_T):
    B, C, H, W = x.shape
    xq = x.astype(jnp.bfloat16).astype(jnp.float32)
    nq = noise.astype(jnp.bfloat16).astype(jnp.float32)
    sa = sched["sqrtab"][_ts][:, None, None, None]
    sb = sched["sqrtmab"][_ts][:, None, None, None]
    x_t = sa * xq + sb * nq
    t_norm = _ts.astype(jnp.float32) / n_T
    cond = (params["temb_w"][None, :] * t_norm[:, None]
            + params["cemb"][c] * (1.0 - context_mask)[:, None])              # (B, C)
    x_t_f = x_t.reshape(B, C, H * W)
    eps_hat = jnp.einsum("oc,bcl->bol", params["w"], x_t_f) + cond[:, :, None]
    diff = nq.reshape(B, C, H * W) - eps_hat
    return jnp.mean(diff * diff)


if __name__ == "__main__":
    # small shapes consistent with the module's NCHW image input + integer class labels
    B, C, H, W = 2, 4, 16, 16
    n_classes = 10
    n_T = 400
    betas = (1e-4, 0.02)
    drop_prob = 0.1

    key = jax.random.PRNGKey(0)
    k_x, k_c, k_w, k_t, k_e, k_fwd = jax.random.split(key, 6)

    x = jax.random.normal(k_x, (B, C, H, W), dtype=jnp.float32)
    c = jax.random.randint(k_c, (B,), 0, n_classes)

    # deterministic synthetic "nn_model" parameters
    params = {
        "w": (0.1 * jax.random.normal(k_w, (C, C))).astype(jnp.float32),            # 1x1-conv channel mix
        "temb_w": (0.1 * jax.random.normal(k_t, (C,))).astype(jnp.float32),          # time embedding weights
        "cemb": (0.1 * jax.random.normal(k_e, (n_classes, C))).astype(jnp.float32),  # class embedding table
    }

    sched = ddpm_schedules(betas[0], betas[1], n_T)

    loss, (ts_used, noise_used, mask_used) = ddpm_forward_loss(
        x, c, k_fwd, params, sched, n_T, drop_prob)
    loss = jax.block_until_ready(loss)

    loss_ref = ddpm_forward_loss_ref(x, c, ts_used, noise_used, mask_used, params, sched, n_T)
    np.testing.assert_allclose(np.asarray(loss), np.asarray(loss_ref), rtol=1e-4, atol=1e-5)

    print("KERNEL_OK")
</pallas_src>

<mosaic_0001>
module attributes {stable_mosaic.version = 11 : i64} {
  func.func @ddpm_loss_kernel(%arg0: i32, %arg1: memref<3x8x1xf32, #tpu.memory_space<vmem>>, %arg2: memref<8x8xf32, #tpu.memory_space<vmem>>, %arg3: memref<8x256xbf16, #tpu.memory_space<vmem>>, %arg4: memref<8x256xbf16, #tpu.memory_space<vmem>>, %arg5: memref<1x8x128xf32, #tpu.memory_space<vmem>>) attributes {dimension_semantics = [#tpu.dimension_semantics<parallel>], iteration_bounds = array<i64: 1>, scalar_prefetch = 0 : i64, scratch_operands = 0 : i64, tpu.core_type = #tpu.core_type<tc>, window_params = [{pipeline_mode = #tpu.pipeline_mode<synchronous>, transform_indices = @transform_0, window_bounds = array<i64: 3, 8, 1>}, {pipeline_mode = #tpu.pipeline_mode<synchronous>, transform_indices = @transform_1, window_bounds = array<i64: 8, 8>}, {transform_indices = @transform_2, window_bounds = array<i64: 8, 256>}, {transform_indices = @transform_3, window_bounds = array<i64: 8, 256>}, {transform_indices = @transform_4, window_bounds = array<i64: 1, 8, 128>}]} {
    %c0 = arith.constant 0 : index
    %c0_0 = arith.constant 0 : index
    %c0_1 = arith.constant 0 : index
    %0 = vector.load %arg1[%c0, %c0_0, %c0_1] : memref<3x8x1xf32, #tpu.memory_space<vmem>>, vector<1x8x1xf32>
    %1 = vector.shape_cast %0 : vector<1x8x1xf32> to vector<8x1xf32>
    %c1 = arith.constant 1 : index
    %c0_2 = arith.constant 0 : index
    %c0_3 = arith.constant 0 : index
    %2 = vector.load %arg1[%c1, %c0_2, %c0_3] : memref<3x8x1xf32, #tpu.memory_space<vmem>>, vector<1x8x1xf32>
    %3 = vector.shape_cast %2 : vector<1x8x1xf32> to vector<8x1xf32>
    %c2 = arith.constant 2 : index
    %c0_4 = arith.constant 0 : index
    %c0_5 = arith.constant 0 : index
    %4 = vector.load %arg1[%c2, %c0_4, %c0_5] : memref<3x8x1xf32, #tpu.memory_space<vmem>>, vector<1x8x1xf32>
    %5 = vector.shape_cast %4 : vector<1x8x1xf32> to vector<8x1xf32>
    %c0_6 = arith.constant 0 : index
    %c0_7 = arith.constant 0 : index
    %6 = vector.load %arg3[%c0_6, %c0_7] : memref<8x256xbf16, #tpu.memory_space<vmem>>, vector<8x256xbf16>
    %7 = arith.extf %6 : vector<8x256xbf16> to vector<8x256xf32>
    %c0_8 = arith.constant 0 : index
    %c0_9 = arith.constant 0 : index
    %8 = vector.load %arg4[%c0_8, %c0_9] : memref<8x256xbf16, #tpu.memory_space<vmem>>, vector<8x256xbf16>
    %9 = arith.extf %8 : vector<8x256xbf16> to vector<8x256xf32>
    %10 = vector.broadcast %1 : vector<8x1xf32> to vector<8x256xf32>
    %11 = arith.mulf %10, %7 : vector<8x256xf32>
    %12 = vector.broadcast %3 : vector<8x1xf32> to vector<8x256xf32>
    %13 = arith.mulf %12, %9 : vector<8x256xf32>
    %14 = arith.addf %11, %13 : vector<8x256xf32>
    %c0_10 = arith.constant 0 : index
    %c0_11 = arith.constant 0 : index
    %15 = vector.load %arg2[%c0_10, %c0_11] : memref<8x8xf32, #tpu.memory_space<vmem>>, vector<8x8xf32>
    %cst = arith.constant dense<0.000000e+00> : vector<8x256xf32>
    %16 = tpu.matmul %15, %14, %cst {dimension_numbers = #tpu.dot_dimension_numbers<[1], [0], [0], [1], [0, 0, 1, 1], [], []>} : vector<8x8xf32>, vector<8x256xf32>, vector<8x256xf32> -> vector<8x256xf32>
    %17 = vector.broadcast %5 : vector<8x1xf32> to vector<8x256xf32>
    %18 = arith.addf %16, %17 : vector<8x256xf32>
    %19 = arith.subf %9, %18 : vector<8x256xf32>
    %20 = arith.mulf %19, %19 : vector<8x256xf32>
    %21 = vector.extract_strided_slice %20 {offsets = [0, 0], sizes = [8, 128], strides = [1, 1]} : vector<8x256xf32> to vector<8x128xf32>
    %22 = vector.extract_strided_slice %20 {offsets = [0, 128], sizes = [8, 128], strides = [1, 1]} : vector<8x256xf32> to vector<8x128xf32>
    %23 = arith.addf %21, %22 : vector<8x128xf32>
    %c0_12 = arith.constant 0 : index
    %c0_13 = arith.constant 0 : index
    %c0_14 = arith.constant 0 : index
    %24 = vector.load %arg5[%c0_12, %c0_13, %c0_14] : memref<1x8x128xf32, #tpu.memory_space<vmem>>, vector<1x8x128xf32>
    %25 = vector.shape_cast %24 : vector<1x8x128xf32> to vector<8x128xf32>
    %26 = vector.shape_cast %23 : vector<8x128xf32> to vector<1x8x128xf32>
    tpu.vector_store %arg5[%c0_12, %c0_13, %c0_14], %26 {strides = array<i32>} : memref<1x8x128xf32, #tpu.memory_space<vmem>>, vector<1x8x128xf32>,
    return
  }
  func.func @transform_0(%arg0: i32) -> (i32, i32, i32) {
    %c0_i32 = arith.constant 0 : i32
    %c0_i32_0 = arith.constant 0 : i32
    %c0_i32_1 = arith.constant 0 : i32
    %c0_i32_2 = arith.constant 0 : i32
    return %c0_i32, %c0_i32_0, %c0_i32_1 : i32, i32, i32
  }
  func.func @transform_1(%arg0: i32) -> (i32, i32) {
    %c0_i32 = arith.constant 0 : i32
    %c0_i32_0 = arith.constant 0 : i32
    %c0_i32_1 = arith.constant 0 : i32
    return %c0_i32, %c0_i32_0 : i32, i32
  }
  func.func @transform_2(%arg0: i32) -> (i32, i32) {
    %c0_i32 = arith.constant 0 : i32
    %c0_i32_0 = arith.constant 0 : i32
    return %c0_i32, %arg0 : i32, i32
  }
  func.func @transform_3(%arg0: i32) -> (i32, i32) {
    %c0_i32 = arith.constant 0 : i32
    %c0_i32_0 = arith.constant 0 : i32
    return %c0_i32, %arg0 : i32, i32
  }
  func.func @transform_4(%arg0: i32) -> (i32, i32, i32) {
    %c0_i32 = arith.constant 0 : i32
    %c0_i32_0 = arith.constant 0 : i32
    %c0_i32_1 = arith.constant 0 : i32
    return %arg0, %c0_i32, %c0_i32_0 : i32, i32, i32
  }
}

</mosaic_0001>

<bundles_post_ra>
// kernel: tpu_custom_call.1
= control target key start
LH: loop header
LB: loop body
LE: loop exit
PB: predicated region body
PF: predicated region fallthrough
CT: control target
= control target key end

     0   :  { %v178_v1 = vmov 0   ;;  %s236_s0 = inlined_call_operand.vmem [shape: f32[3,8,1], index: 0, kind: input, shape index: {}]   ;;  %s237_s1 = inlined_call_operand.vmem [shape: f32[8,8], index: 1, kind: input, shape index: {}]   ;;  %s238_s2 = inlined_call_operand.vmem [shape: bf16[8,256], index: 2, kind: input, shape index: {}]   ;;  %s239_s3 = inlined_call_operand.vmem [shape: bf16[8,256], index: 3, kind: input, shape index: {}]   ;;  %s240_s4 = inlined_call_operand.hbm [shape: f32[1,8,128], index: 4, kind: output, shape index: {}]  }
   0x1   :  { %v18_v0 = vld [vmem:[%s236_s0] sm:$0xff]  ;;  %152 = vset.pattern.permute.xlu0 %v178_v1  ;;  %153 = vset.pattern.permute.xlu1 %v178_v1 }
   0x2   :  { %9 = vsyncpa [#allocation3], 0  ;;  %31 = vperm.xlu0 %152, %v18_v0   ;;  %v146_v2 = vld [vmem:[%s236_s0 + $0x8] sm:$0xff]  ;;  %v179_v3 = vmov 0.0   ;;  %v147_v4 = vld [vmem:[%s236_s0 + $0x10] sm:$0xff]  ;;  %vm51_vm0 = vcmask 64512  }
   0x3   :  { %119 = vmatprep.mubr.f32.mxu0 %v179_v3  ;;  %48 = vperm.xlu1 %153, %v147_v4   ;;  %v23_v5 = vld [vmem:[%s238_s2] sm:$0xff]  ;;  %s180_s2 = smov [#allocation2]  }
   0x4   :  { %v26_v6 = vld [vmem:[%s239_s3] sm:$0xff]  ;;  %v24_v8 = vunpack.c.l.bf16 %v23_v5  ;;  %v25_v9 = vunpack.c.h.bf16 %v23_v5  ;;  %s138_s3 = sshll.u32 %s180_s2, 4  ;;  %s139_s3 = int_to_ptr.vmem [resolvable:$true] %s138_s3 }
   0x5   :  { %v27_v10 = vunpack.c.l.bf16 %v26_v6  ;;  %v28_v11 = vunpack.c.h.bf16 %v26_v6  ;;  %v45_v19 = vld [vmem:[%s237_s1] sm:$0xff]  ;;  %s154_s26 = scalar_lea.vmem %s139_s3, 128  ;;  %p159_p1 = scmp.lt.s32.totalorder %s139_s3, %s139_s3 }
   0x6   :  { %38 = vperm.xlu0 %152, %v146_v2   ;;  %p155_p0 = scmp.ne.s32.totalorder %s139_s3, %s154_s26  ;;  %p160_p2 = scmp.lt.s32.totalorder %s154_s26, %s154_s26 }
   0x8   :  { %p161_p3 = por %p160_p2, %p159_p1 }
   0xa   :  { %p162_p4 = pnand %p161_p3, %p155_p0 }
  0x81   :  { %v32_v7 = vpop.permute.xlu0 %31 }
  0x82   :  { %v34_v13 = vmul.f32 %v32_v7, %v24_v8  ;;  %v35_v14 = vmul.f32 %v32_v7, %v25_v9  ;;  %v49_v20 = vpop.permute.xlu1 %48 }
  0x85   :  { %v39_v12 = vpop.permute.xlu0 %38 }
  0x86   :  { %v41_v15 = vmul.f32 %v39_v12, %v27_v10  ;;  %v42_v16 = vmul.f32 %v39_v12, %v28_v11 }
  0x88   :  { %v44_v17 = vadd.f32 %v42_v16, %v35_v14  ;;  %v43_v18 = vadd.f32 %v41_v15, %v34_v13 }
  0x8a   :  { %55 = vmatprep.subr.mxu0 %v44_v17 }
  0x8b   :  { %56 = vmatpush1.msra.mxu0 %v43_v18 }
  0x8c   :  { %148 = vmatmul.mubr.msk.f32.vlgmr.msra.gmra.mrb[0].mxu0 %vm51_vm0, %v45_v19 }
 0x15f   :  { %v121_v21 = vpop.f32.mrb[0].mxu0 }
 0x160   :  { %v122_v22 = vadd.f32 %v121_v21, %v49_v20  ;;  %v123_v23 = vpop.f32.mrb[1].mxu0 }
 0x161   :  { %v124_v24 = vadd.f32 %v123_v23, %v49_v20 }
 0x162   :  { %v126_v25 = vsub.f32 %v27_v10, %v122_v22 }
 0x163   :  { %v127_v26 = vsub.f32 %v28_v11, %v124_v24 }
 0x164   :  { %v128_v27 = vmul.f32 %v126_v25, %v126_v25 }
 0x165   :  { %v129_v28 = vmul.f32 %v127_v26, %v127_v26 }
 0x167   :  { %v130_v29 = vadd.f32 %v129_v28, %v128_v27 }
 0x169   :  { %131 = vst [vmem:[#allocation2] sm:$0xff] %v130_v29 }
 0x16a   :  { %165 = shalt.err (!%p162_p4)
}
 0x16b   :  { %s166_s28 = scalar_lea.hbm %s240_s4, 128 }
 0x16c   :  { %p167_p5 = scmp.ne.s32.totalorder %s240_s4, %s166_s28  ;;  %p170_p6 = scmp.lt.u32.totalorder %s166_s28, %s240_s4 }
 0x16e   :  { %p172_p7 = pnand %p170_p6, %p167_p5 }
 0x170   :  { %175 = shalt.err (!%p172_p7)
}
 0x171   :  { %141 = dma.vmem_to_hbm [thread:$0]  %s139_s3, 128, %s240_s4, [#allocation3]  }
 0x172   :  { %176 = dma.done.wait [#allocation3], 128  }
 0x173   :  { %177 = vsyncadd [#allocation3], 4294967168 }
 0x174   :  { %145 = vsyncpa [#allocation3], 1 }

</bundles_post_ra>
